<compile_context>
chip_gen: v5e
topology: v5e:2x2
jax: 0.10.0
libtpu: 0.0.40
codegen_flags: <defaults>
</compile_context>

<pallas_src>
import functools

import numpy as np
import jax
import jax.numpy as jnp
from jax.experimental import pallas as pl
from jax.experimental.pallas import tpu as pltpu


def _attention_head_kernel(x_ref, wqkv_ref, bqkv_ref, o_ref, *,
                           n_seq, head_dim, section_stride, inv_sqrt_hd):
    # x_ref:    (bt, N, D)   batch tile of inputs
    # wqkv_ref: (D, Wc)      fused [Wq | Wk | Wv], sections start at k*section_stride (k*128)
    # bqkv_ref: (1, Wc)      fused biases (same layout)
    # o_ref:    (bt, N, H)
    bt = x_ref.shape[0]
    d = x_ref.shape[2]
    m = bt * n_seq

    # Single fused QKV projection: flatten (bt, N) -> M so one bf16 MXU matmul with f32
    # accumulation covers all three projections (lane-wide, grid-invariant RHS).
    x2d = x_ref[...].reshape(m, d).astype(jnp.bfloat16)
    w = wqkv_ref[...].astype(jnp.bfloat16)
    qkv = jnp.dot(x2d, w, preferred_element_type=jnp.float32) + bqkv_ref[...]

    def _section(i):
        lo = i * section_stride                     # multiple of 128 -> vreg-aligned slice
        return qkv[:, lo:lo + head_dim].reshape(bt, n_seq, head_dim)

    q, k, v = _section(0), _section(1), _section(2)

    # Scaled scores, then scores @ v — same operator order as the PyTorch module.
    s = jnp.einsum('bqh,bkh->bqk', q.astype(jnp.bfloat16), k.astype(jnp.bfloat16),
                   preferred_element_type=jnp.float32) * inv_sqrt_hd
    p = jnp.einsum('bqk,bkh->bqh', s.astype(jnp.bfloat16), v.astype(jnp.bfloat16),
                   preferred_element_type=jnp.float32)

    # Softmax over the last (head) dimension — exactly where the module applies it.
    mx = jnp.max(p, axis=-1, keepdims=True)
    e = jnp.exp(p - mx)
    denom = jnp.sum(e, axis=-1, keepdims=True)
    o_ref[...] = (e * pl.reciprocal(denom, approx=False)).astype(o_ref.dtype)


def _tpu_generation():
    """Returns (has_two_tensorcores, vmem_limit_bytes), with conservative fallbacks."""
    kind = ""
    try:
        kind = jax.devices()[0].device_kind.lower()
    except Exception:
        pass
    two_tc = ("v7" in kind) or ("7x" in kind)       # v7x has 2 TensorCores per chip
    vmem_phys = None
    try:
        vmem_phys = int(pltpu.get_tpu_info().vmem_capacity_bytes)
    except Exception:
        vmem_phys = None
    if vmem_phys is None:
        vmem_limit = 32 * 1024 * 1024               # safe on every generation (v7x: 64 MiB phys)
    else:
        vmem_limit = min(64 * 1024 * 1024, vmem_phys // 2)
    return two_tc, vmem_limit


def attention_head_forward(x, wq_t, wk_t, wv_t, bq, bk, bv, *, b_tile=None):
    """x: (B, N, D); w*_t: (D, H) (transposed nn.Linear weights); b*: (1, H) -> (B, N, H)."""
    B, N, D = x.shape
    Dw, H = wq_t.shape
    assert Dw == D
    for w in (wk_t, wv_t):
        assert w.shape == (D, H)
    for b in (bq, bk, bv):
        assert b.shape == (1, H)

    # Fused, lane-tile-aligned QKV weight: each section starts at a multiple of 128 so the
    # kernel splits q/k/v with aligned static slices (guaranteed lowering).
    # TODO(synk): pack densely to (D, 3H) once unaligned lane slices are acceptable; on
    # v6e/v7x that would save one extra MXU pass for the projection.
    h_pad = -(-H // 128) * 128
    w_cols = 2 * h_pad + H
    wqkv = jnp.zeros((D, w_cols), x.dtype)
    bqkv = jnp.zeros((1, w_cols), x.dtype)
    for i, (w_i, b_i) in enumerate(((wq_t, bq), (wk_t, bk), (wv_t, bv))):
        wqkv = wqkv.at[:, i * h_pad:i * h_pad + H].set(w_i)
        bqkv = bqkv.at[:, i * h_pad:i * h_pad + H].set(b_i)

    two_tc, vmem_limit = _tpu_generation()

    if b_tile is None:
        # Only the DMA'd arrays (x tile, output tile) are double-buffered; the fused weight
        # is grid-invariant and q/k/v/scores are live-once intermediates (counted once).
        fixed_bytes = 2 * (D * w_cols + w_cols) * 4 + (2 << 20)   # weights (dbl-buffered) + headroom
        bytes_per_row = (
            2 * N * D * 4          # x tile: DMA'd, double-buffered
            + 2 * N * H * 4        # out tile: DMA'd, double-buffered
            + N * D * 2            # bf16 copy of x
            + N * w_cols * 6       # fused qkv (f32) + bf16 operand copies
            + N * N * 6            # scores (f32 + bf16)
            + 3 * N * H * 4        # p / exp / softmax temporaries
        )
        budget = max(bytes_per_row, vmem_limit - fixed_bytes)
        max_bt = max(1, budget // bytes_per_row)
        if two_tc and B >= 2:
            b_tile = min(max_bt, max(1, B // 2))   # v7x: keep >=2 grid steps so both TCs get work
        else:
            b_tile = min(max_bt, B)                # single-TC v5e/v6e: one big step if it fits
    while B % b_tile:
        b_tile -= 1
    grid = (B // b_tile,)
    # TODO(synk): add a q/sequence grid axis once N grows so the (b_tile, N, N) score block
    # stays bounded in VMEM (it grows quadratically in N).

    kernel = functools.partial(
        _attention_head_kernel, n_seq=N, head_dim=H, section_stride=h_pad,
        inv_sqrt_hd=float(1.0 / np.sqrt(H)))

    return pl.pallas_call(
        kernel,
        out_shape=jax.ShapeDtypeStruct((B, N, H), x.dtype),
        grid_spec=pltpu.PrefetchScalarGridSpec(
            num_scalar_prefetch=0,
            grid=grid,
            in_specs=[
                pl.BlockSpec((b_tile, N, D), lambda b: (b, 0, 0)),     # x batch tile
                pl.BlockSpec((D, w_cols), lambda b: (0, 0)),           # fused Wqkv (shared)
                pl.BlockSpec((1, w_cols), lambda b: (0, 0)),           # fused bias  (shared)
            ],
            # TODO(synk): lane-dense (..., 128) output packing (H=64 stores are masked);
            # kept as a plain full-block write to avoid an in-kernel relayout.
            out_specs=pl.BlockSpec((b_tile, N, H), lambda b: (b, 0, 0)),
        ),
        compiler_params=pltpu.CompilerParams(
            dimension_semantics=("parallel",),
            vmem_limit_bytes=int(vmem_limit),
        ),
    )(x, wqkv, bqkv)


if __name__ == "__main__":
    # Shapes consistent with the module: embedding_dim=128 (from the spec),
    # batch=2, seq=8, head_size=64.
    batch, seq, embedding_dim, head_size = 2, 8, 128, 64

    key = jax.random.PRNGKey(0)
    kx, kwq, kwk, kwv, kbq, kbk, kbv = jax.random.split(key, 7)

    x = jax.random.normal(kx, (batch, seq, embedding_dim), dtype=jnp.float32)

    # nn.Linear init range; weights passed already transposed to (D, H).
    bound = 1.0 / np.sqrt(embedding_dim)
    wq_t = jax.random.uniform(kwq, (embedding_dim, head_size), jnp.float32, -bound, bound)
    wk_t = jax.random.uniform(kwk, (embedding_dim, head_size), jnp.float32, -bound, bound)
    wv_t = jax.random.uniform(kwv, (embedding_dim, head_size), jnp.float32, -bound, bound)
    bq = jax.random.uniform(kbq, (1, head_size), jnp.float32, -bound, bound)
    bk = jax.random.uniform(kbk, (1, head_size), jnp.float32, -bound, bound)
    bv = jax.random.uniform(kbv, (1, head_size), jnp.float32, -bound, bound)

    out = attention_head_forward(x, wq_t, wk_t, wv_t, bq, bk, bv)
    out = jax.block_until_ready(out)

    # Pure-JAX reference with identical semantics (and matching bf16-operand / f32-accum
    # numerics) to the PyTorch forward() as implemented in the kernel.
    def _reference(x, wq_t, wk_t, wv_t, bq, bk, bv):
        B, N, D = x.shape
        H = wq_t.shape[1]
        xb = x.reshape(B * N, D).astype(jnp.bfloat16)

        def proj(w, b):
            y = jnp.dot(xb, w.astype(jnp.bfloat16), preferred_element_type=jnp.float32) + b
            return y.reshape(B, N, H)

        q, k, v = proj(wq_t, bq), proj(wk_t, bk), proj(wv_t, bv)
        s = jnp.einsum('bqh,bkh->bqk', q.astype(jnp.bfloat16), k.astype(jnp.bfloat16),
                       preferred_element_type=jnp.float32) / np.sqrt(H)
        p = jnp.einsum('bqk,bkh->bqh', s.astype(jnp.bfloat16), v.astype(jnp.bfloat16),
                       preferred_element_type=jnp.float32)
        return jax.nn.softmax(p, axis=-1)

    ref = jax.block_until_ready(_reference(x, wq_t, wk_t, wv_t, bq, bk, bv))

    assert out.shape == (batch, seq, head_size)
    np.testing.assert_allclose(np.asarray(out), np.asarray(ref), rtol=2e-3, atol=2e-4)

    print("KERNEL_OK")
</pallas_src>

<mosaic_0001>
module attributes {stable_mosaic.version = 11 : i64} {
  func.func @_attention_head_kernel(%arg0: i32, %arg1: memref<2x8x128xf32, #tpu.memory_space<vmem>>, %arg2: memref<128x320xf32, #tpu.memory_space<vmem>>, %arg3: memref<1x320xf32, #tpu.memory_space<vmem>>, %arg4: memref<2x8x64xf32, #tpu.memory_space<vmem>>) attributes {dimension_semantics = [#tpu.dimension_semantics<parallel>], iteration_bounds = array<i64: 1>, scalar_prefetch = 0 : i64, scratch_operands = 0 : i64, tpu.core_type = #tpu.core_type<tc>, window_params = [{transform_indices = @transform_0, window_bounds = array<i64: 2, 8, 128>}, {pipeline_mode = #tpu.pipeline_mode<synchronous>, transform_indices = @transform_1, window_bounds = array<i64: 128, 320>}, {pipeline_mode = #tpu.pipeline_mode<synchronous>, transform_indices = @transform_2, window_bounds = array<i64: 1, 320>}, {transform_indices = @transform_3, window_bounds = array<i64: 2, 8, 64>}]} {
    %c0 = arith.constant 0 : index
    %c0_0 = arith.constant 0 : index
    %c0_1 = arith.constant 0 : index
    %0 = vector.load %arg1[%c0, %c0_0, %c0_1] : memref<2x8x128xf32, #tpu.memory_space<vmem>>, vector<2x8x128xf32>
    %1 = vector.shape_cast %0 : vector<2x8x128xf32> to vector<16x128xf32>
    %2 = arith.truncf %1 : vector<16x128xf32> to vector<16x128xbf16>
    %c0_2 = arith.constant 0 : index
    %c0_3 = arith.constant 0 : index
    %3 = vector.load %arg2[%c0_2, %c0_3] : memref<128x320xf32, #tpu.memory_space<vmem>>, vector<128x320xf32>
    %4 = arith.truncf %3 : vector<128x320xf32> to vector<128x320xbf16>
    %cst = arith.constant dense<0.000000e+00> : vector<16x320xf32>
    %5 = tpu.matmul %2, %4, %cst {dimension_numbers = #tpu.dot_dimension_numbers<[1], [0], [0], [1], [0, 0, 1, 1], [], []>} : vector<16x128xbf16>, vector<128x320xbf16>, vector<16x320xf32> -> vector<16x320xf32>
    %c0_4 = arith.constant 0 : index
    %c0_5 = arith.constant 0 : index
    %6 = vector.load %arg3[%c0_4, %c0_5] : memref<1x320xf32, #tpu.memory_space<vmem>>, vector<1x320xf32>
    %7 = vector.broadcast %6 : vector<1x320xf32> to vector<16x320xf32>
    %8 = arith.addf %5, %7 : vector<16x320xf32>
    %9 = vector.extract_strided_slice %8 {offsets = [0, 0], sizes = [16, 64], strides = [1, 1]} : vector<16x320xf32> to vector<16x64xf32>
    %10 = vector.shape_cast %9 : vector<16x64xf32> to vector<2x8x64xf32>
    %11 = vector.extract_strided_slice %8 {offsets = [0, 128], sizes = [16, 64], strides = [1, 1]} : vector<16x320xf32> to vector<16x64xf32>
    %12 = vector.shape_cast %11 : vector<16x64xf32> to vector<2x8x64xf32>
    %13 = vector.extract_strided_slice %8 {offsets = [0, 256], sizes = [16, 64], strides = [1, 1]} : vector<16x320xf32> to vector<16x64xf32>
    %14 = vector.shape_cast %13 : vector<16x64xf32> to vector<2x8x64xf32>
    %15 = arith.truncf %10 : vector<2x8x64xf32> to vector<2x8x64xbf16>
    %16 = arith.truncf %12 : vector<2x8x64xf32> to vector<2x8x64xbf16>
    "tpu.trace_start"() <{level = 10 : i32, message = "bqh,bkh->bqk"}> : () -> ()
    %cst_6 = arith.constant dense<0.000000e+00> : vector<2x8x8xf32>
    %17 = tpu.matmul %15, %16, %cst_6 {dimension_numbers = #tpu.dot_dimension_numbers<[2], [2], [1], [1], [0, 0, 0, 1, 1, 1], [0], [0]>} : vector<2x8x64xbf16>, vector<2x8x64xbf16>, vector<2x8x8xf32> -> vector<2x8x8xf32>
    "tpu.trace_stop"() : () -> ()
    %cst_7 = arith.constant 1.250000e-01 : f32
    %18 = vector.broadcast %cst_7 : f32 to vector<2x8x8xf32>
    %19 = arith.mulf %17, %18 : vector<2x8x8xf32>
    %20 = arith.truncf %19 : vector<2x8x8xf32> to vector<2x8x8xbf16>
    %21 = arith.truncf %14 : vector<2x8x64xf32> to vector<2x8x64xbf16>
    "tpu.trace_start"() <{level = 10 : i32, message = "bqk,bkh->bqh"}> : () -> ()
    %cst_8 = arith.constant dense<0.000000e+00> : vector<2x8x64xf32>
    %22 = tpu.matmul %20, %21, %cst_8 {dimension_numbers = #tpu.dot_dimension_numbers<[2], [1], [1], [2], [0, 0, 0, 1, 1, 2], [0], [0]>} : vector<2x8x8xbf16>, vector<2x8x64xbf16>, vector<2x8x64xf32> -> vector<2x8x64xf32>
    "tpu.trace_stop"() : () -> ()
    %cst_9 = arith.constant dense<0xFF800000> : vector<2x8xf32>
    %23 = vector.multi_reduction <maximumf>, %22, %cst_9 [2] : vector<2x8x64xf32> to vector<2x8xf32>
    %24 = vector.shape_cast %23 : vector<2x8xf32> to vector<2x8x1xf32>
    %25 = vector.broadcast %24 : vector<2x8x1xf32> to vector<2x8x64xf32>
    %26 = arith.subf %22, %25 : vector<2x8x64xf32>
    %27 = math.exp %26 : vector<2x8x64xf32>
    %cst_10 = arith.constant dense<0.000000e+00> : vector<2x8xf32>
    %28 = vector.multi_reduction <add>, %27, %cst_10 [2] : vector<2x8x64xf32> to vector<2x8xf32>
    %29 = vector.shape_cast %28 : vector<2x8xf32> to vector<2x8x1xf32>
    %30 = tpu.reciprocal %29 : vector<2x8x1xf32> -> vector<2x8x1xf32>
    %31 = vector.broadcast %30 : vector<2x8x1xf32> to vector<2x8x64xf32>
    %32 = arith.mulf %27, %31 : vector<2x8x64xf32>
    %c0_11 = arith.constant 0 : index
    %c0_12 = arith.constant 0 : index
    %c0_13 = arith.constant 0 : index
    %33 = vector.load %arg4[%c0_11, %c0_12, %c0_13] : memref<2x8x64xf32, #tpu.memory_space<vmem>>, vector<2x8x64xf32>
    tpu.vector_store %arg4[%c0_11, %c0_12, %c0_13], %32 {strides = array<i32>} : memref<2x8x64xf32, #tpu.memory_space<vmem>>, vector<2x8x64xf32>,
    return
  }
  func.func @transform_0(%arg0: i32) -> (i32, i32, i32) {
    %c0_i32 = arith.constant 0 : i32
    %c0_i32_0 = arith.constant 0 : i32
    %c0_i32_1 = arith.constant 0 : i32
    return %arg0, %c0_i32, %c0_i32_0 : i32, i32, i32
  }
  func.func @transform_1(%arg0: i32) -> (i32, i32) {
    %c0_i32 = arith.constant 0 : i32
    %c0_i32_0 = arith.constant 0 : i32
    %c0_i32_1 = arith.constant 0 : i32
    return %c0_i32, %c0_i32_0 : i32, i32
  }
  func.func @transform_2(%arg0: i32) -> (i32, i32) {
    %c0_i32 = arith.constant 0 : i32
    %c0_i32_0 = arith.constant 0 : i32
    %c0_i32_1 = arith.constant 0 : i32
    return %c0_i32, %c0_i32_0 : i32, i32
  }
  func.func @transform_3(%arg0: i32) -> (i32, i32, i32) {
    %c0_i32 = arith.constant 0 : i32
    %c0_i32_0 = arith.constant 0 : i32
    %c0_i32_1 = arith.constant 0 : i32
    return %arg0, %c0_i32, %c0_i32_0 : i32, i32, i32
  }
}

</mosaic_0001>

<bundles_post_ra>
// kernel: tpu_custom_call.1
= control target key start
LH: loop header
LB: loop body
LE: loop exit
PB: predicated region body
PF: predicated region fallthrough
CT: control target
= control target key end

     0   :  { %s528_s0 = inlined_call_operand.vmem [shape: f32[2,8,128], index: 0, kind: input, shape index: {}]   ;;  %s529_s1 = inlined_call_operand.vmem [shape: f32[128,320], index: 1, kind: input, shape index: {}]   ;;  %s530_s2 = inlined_call_operand.vmem [shape: f32[1,320], index: 2, kind: input, shape index: {}]   ;;  %s531_s3 = inlined_call_operand.hbm [shape: f32[2,8,64], index: 3, kind: output, shape index: {}]  }
   0x1   :  { %v62_v0 = vld [vmem:[%s529_s1 + $0x158] sm:$0xff]  ;;  %v65_v1 = vld [vmem:[%s529_s1 + $0x170] sm:$0xff]  ;;  %v64_v4 = vld [vmem:[%s529_s1 + $0x168] sm:$0xff] }
   0x2   :  { %v61_v2 = vld [vmem:[%s529_s1 + $0x150] sm:$0xff]  ;;  %v89_v3 = vpack.c.bf16 %v65_v1, %v62_v0  ;;  %v56_v5 = vld [vmem:[%s529_s1 + $0x128] sm:$0xff]  ;;  %v59_v6 = vld [vmem:[%s529_s1 + $0x140] sm:$0xff] }
   0x3   :  { %v88_v7 = vpack.c.bf16 %v64_v4, %v61_v2  ;;  %v55_v8 = vld [vmem:[%s529_s1 + $0x120] sm:$0xff]  ;;  %v58_v9 = vld [vmem:[%s529_s1 + $0x138] sm:$0xff]  ;;  %v86_v10 = vpack.c.bf16 %v59_v6, %v56_v5  ;;  %v53_v13 = vld [vmem:[%s529_s1 + $0x110] sm:$0xff] }
   0x4   :  { %113 = vmatpush.bf16.msra.mxu1 %v89_v3  ;;  %v85_v11 = vpack.c.bf16 %v58_v9, %v55_v8  ;;  %v50_v12 = vld [vmem:[%s529_s1 + $0xf8] sm:$0xff]  ;;  %v49_v14 = vld [vmem:[%s529_s1 + $0xf0] sm:$0xff]  ;;  %v52_v15 = vld [vmem:[%s529_s1 + $0x108] sm:$0xff] }
   0x5   :  { %99 = vmatpush.bf16.msra.mxu0 %v88_v7  ;;  %v83_v16 = vpack.c.bf16 %v53_v13, %v50_v12  ;;  %v82_v17 = vpack.c.bf16 %v52_v15, %v49_v14  ;;  %v44_v18 = vld [vmem:[%s529_s1 + $0xc8] sm:$0xff]  ;;  %v47_v19 = vld [vmem:[%s529_s1 + $0xe0] sm:$0xff]  ;;  %v46_v21 = vld [vmem:[%s529_s1 + $0xd8] sm:$0xff] }
   0x6   :  { %v43_v20 = vld [vmem:[%s529_s1 + $0xc0] sm:$0xff]  ;;  %v80_v22 = vpack.c.bf16 %v47_v19, %v44_v18  ;;  %v38_v23 = vld [vmem:[%s529_s1 + $0x98] sm:$0xff]  ;;  %v41_v27 = vld [vmem:[%s529_s1 + $0xb0] sm:$0xff] }
   0x7   :  { %v63_v24 = vld [vmem:[%s529_s1 + $0x160] sm:$0xff]  ;;  %v66_v25 = vld [vmem:[%s529_s1 + $0x178] sm:$0xff]  ;;  %v79_v26 = vpack.c.bf16 %v46_v21, %v43_v20  ;;  %v57_v29 = vld [vmem:[%s529_s1 + $0x130] sm:$0xff]  ;;  %v77_v34 = vpack.c.bf16 %v41_v27, %v38_v23 }
   0x8   :  { %114 = vmatpush.bf16.msra.mxu1 %v86_v10  ;;  %v90_v28 = vpack.c.bf16 %v66_v25, %v63_v24  ;;  %v60_v30 = vld [vmem:[%s529_s1 + $0x148] sm:$0xff]  ;;  %v37_v31 = vld [vmem:[%s529_s1 + $0x90] sm:$0xff]  ;;  %v51_v35 = vld [vmem:[%s529_s1 + $0x100] sm:$0xff] }
   0x9   :  { %100 = vmatpush.bf16.msra.mxu0 %v85_v11  ;;  %v40_v32 = vld [vmem:[%s529_s1 + $0xa8] sm:$0xff]  ;;  %v87_v33 = vpack.c.bf16 %v60_v30, %v57_v29  ;;  %v54_v36 = vld [vmem:[%s529_s1 + $0x118] sm:$0xff]  ;;  %v35_v39 = vld [vmem:[%s529_s1 + $0x80] sm:$0xff] }
   0xa   :  { %127 = vmatpush.bf16.msra.mxu2 %v90_v28  ;;  %v76_v37 = vpack.c.bf16 %v40_v32, %v37_v31  ;;  %v32_v38 = vld [vmem:[%s529_s1 + $0x68] sm:$0xff]  ;;  %v31_v40 = vld [vmem:[%s529_s1 + $0x60] sm:$0xff]  ;;  %v34_v41 = vld [vmem:[%s529_s1 + $0x78] sm:$0xff] }
   0xc   :  { %115 = vmatpush.bf16.msra.mxu1 %v83_v16 }
   0xd   :  { %101 = vmatpush.bf16.msra.mxu0 %v82_v17 }
  0x10   :  { %116 = vmatpush.bf16.msra.mxu1 %v80_v22 }
  0x11   :  { %102 = vmatpush.bf16.msra.mxu0 %v79_v26 }
  0x12   :  { %8 = vsyncpa [#allocation3], 0  ;;  %128 = vmatpush.bf16.msra.mxu2 %v87_v33  ;;  %v84_v42 = vpack.c.bf16 %v54_v36, %v51_v35  ;;  %v74_v43 = vpack.c.bf16 %v35_v39, %v32_v38  ;;  %v45_v44 = vld [vmem:[%s529_s1 + $0xd0] sm:$0xff]  ;;  %v48_v45 = vld [vmem:[%s529_s1 + $0xe8] sm:$0xff]  ;;  %v73_v46 = vpack.c.bf16 %v34_v41, %v31_v40  ;;  %vm145_vm0 = vcmask 523264   ;;  %s286_s7 = sshll.u32 %s531_s3, 4  ;;  %s287_s7 = int_to_ptr.hbm [resolvable:$true] %s286_s7 }
  0x13   :  { %v26_v47 = vld [vmem:[%s529_s1 + $0x38] sm:$0xff]  ;;  %v29_v48 = vld [vmem:[%s529_s1 + $0x50] sm:$0xff]  ;;  %v28_v50 = vld [vmem:[%s529_s1 + $0x48] sm:$0xff]  ;;  %v81_v51 = vpack.c.bf16 %v48_v45, %v45_v44  ;;  %vm194_vm1 = vcmask 1043456   ;;  %vm190_vm2 = vcmask 64512   ;;  %s340_s8 = smov 128  }
  0x14   :  { %117 = vmatpush.bf16.msra.mxu1 %v77_v34  ;;  %v25_v49 = vld [vmem:[%s529_s1 + $0x30] sm:$0xff]  ;;  %v71_v52 = vpack.c.bf16 %v29_v48, %v26_v47  ;;  %v39_v53 = vld [vmem:[%s529_s1 + $0xa0] sm:$0xff]  ;;  %v42_v54 = vld [vmem:[%s529_s1 + $0xb8] sm:$0xff]  ;;  %s341_s9 = smov 8  }
  0x15   :  { %103 = vmatpush.bf16.msra.mxu0 %v76_v37  ;;  %v70_v55 = vpack.c.bf16 %v28_v50, %v25_v49  ;;  %v20_v56 = vld [vmem:[%s529_s1 + $0x8] sm:$0xff]  ;;  %v23_v57 = vld [vmem:[%s529_s1 + $0x20] sm:$0xff]  ;;  %v22_v59 = vld [vmem:[%s529_s1 + $0x18] sm:$0xff]  ;;  %v78_v61 = vpack.c.bf16 %v42_v54, %v39_v53 }
  0x16   :  { %129 = vmatpush.bf16.msra.mxu2 %v84_v42  ;;  %v19_v58 = vld [vmem:[%s529_s1] sm:$0xff]  ;;  %v68_v62 = vpack.c.bf16 %v23_v57, %v20_v56  ;;  %v17_v63 = vld [vmem:[%s528_s0 + $0x8] sm:$0xff]  ;;  %v33_v0 = vld [vmem:[%s529_s1 + $0x70] sm:$0xff] }
  0x17   :  { %v16_v60 = vld [vmem:[%s528_s0] sm:$0xff]  ;;  %v36_v1 = vld [vmem:[%s529_s1 + $0x88] sm:$0xff]  ;;  %v67_v2 = vpack.c.bf16 %v22_v59, %v19_v58  ;;  %v30_v6 = vld [vmem:[%s529_s1 + $0x58] sm:$0xff] }
  0x18   :  { %118 = vmatpush.bf16.msra.mxu1 %v74_v43  ;;  %v18_v3 = vpack.c.bf16 %v17_v63, %v16_v60  ;;  %v75_v4 = vpack.c.bf16 %v36_v1, %v33_v0  ;;  %v27_v5 = vld [vmem:[%s529_s1 + $0x40] sm:$0xff]  ;;  %v21_v8 = vld [vmem:[%s529_s1 + $0x10] sm:$0xff]  ;;  %v24_v9 = vld [vmem:[%s529_s1 + $0x28] sm:$0xff]  ;;  %s339_s1 = smov [#allocation2]  }
  0x19   :  { %104 = vmatpush.bf16.msra.mxu0 %v73_v46  ;;  %v72_v7 = vpack.c.bf16 %v30_v6, %v27_v5  ;;  %v69_v10 = vpack.c.bf16 %v24_v9, %v21_v8  ;;  %v91_v11 = vld [vmem:[%s530_s2] sm:$0x7]  ;;  %s284_s2 = sshll.u32 %s339_s1, 4  ;;  %s285_s2 = int_to_ptr.vmem [resolvable:$true] %s284_s2 }
  0x1a   :  { %130 = vmatpush.bf16.msra.mxu2 %v81_v51  ;;  %v94_v12 = vperm.slane %v91_v11, 1  ;;  %v93_v15 = vperm.slane %v91_v11, 0  ;;  %v95_v25 = vperm.slane %v91_v11, 2 }
  0x1c   :  { %119 = vmatpush.bf16.msra.mxu1 %v71_v52 }
  0x1d   :  { %105 = vmatpush.bf16.msra.mxu0 %v70_v55 }
  0x1e   :  { %131 = vmatpush.bf16.msra.mxu2 %v78_v61 }
  0x20   :  { %120 = vmatpush.bf16.msra.mxu1 %v68_v62 }
  0x21   :  { %106 = vmatpush.bf16.msra.mxu0 %v67_v2 }
  0x22   :  { %132 = vmatpush.bf16.msra.mxu2 %v75_v4 }
  0x23   :  { %121 = vmatmul.bf16.vlgmr.msra.gmra.mxu1 %v18_v3 }
  0x24   :  { %107 = vmatmul.bf16.vlgmr.msra.gmra.mxu0 %v18_v3 }
  0x26   :  { %133 = vmatpush.bf16.msra.mxu2 %v72_v7 }
  0x2a   :  { %134 = vmatpush.bf16.msra.mxu2 %v69_v10 }
  0x2d   :  { %135 = vmatmul.bf16.vlgmr.msra.gmra.mxu2 %v18_v3 }
  0xa0   :  { %v122_v13 = vpop.f32.mrf.mxu1 }
  0xa1   :  { %v123_v14 = vadd.f32 %v122_v13, %v94_v12  ;;  %v108_v17 = vpop.f32.mrf.mxu0 }
  0xa2   :  { %v109_v18 = vadd.f32 %v108_v17, %v93_v15 }
  0xa3   :  { %v143_v16 = vpack.c.bf16 %v123_v14, %v123_v14 }
  0xa4   :  { %v141_v21 = vpack.c.bf16 %v109_v18, %v109_v18 }
  0xa5   :  { %v150_v19 = vsel %vm145_vm0, %v143_v16, 0 }
  0xa6   :  { %159 = vmatpush.bf16.xpose.msra.mxu3 %v150_v19 }
  0xa8   :  { %v124_v20 = vpop.f32.mrf.mxu1 }
  0xa9   :  { %v125_v22 = vadd.f32 %v124_v20, %v94_v12  ;;  %v110_v28 = vpop.f32.mrf.mxu0 }
  0xaa   :  { %v111_v31 = vadd.f32 %v110_v28, %v93_v15 }
  0xab   :  { %v144_v23 = vpack.c.bf16 %v125_v22, %v125_v22 }
  0xac   :  { %v142_v34 = vpack.c.bf16 %v111_v31, %v111_v31 }
  0xad   :  { %298 = vmatmul.msk.bf16.vlgmr.msra.gmra.mxu3 %vm145_vm0, %v141_v21  ;;  %v169_v24 = vsel %vm145_vm0, %v144_v23, 0 }
  0xae   :  { %178 = vmatpush.bf16.xpose.msrb.mxu3 %v169_v24 }
  0xb0   :  { %v136_v26 = vpop.f32.mrf.mxu2 }
  0xb1   :  { %v137_v27 = vadd.f32 %v136_v26, %v95_v25 }
  0xb3   :  { %v188_v29 = vpack.c.bf16 %v137_v27, %v137_v27 }
  0xb5   :  { %v196_v30 = vsel %vm194_vm1, %v188_v29, 0 }
  0xb6   :  { %205 = vmatpush.bf16.msra.mxu3 %v196_v30 }
  0xb8   :  { %v138_v32 = vpop.f32.mrf.mxu2 }
  0xb9   :  { %v139_v33 = vadd.f32 %v138_v32, %v95_v25 }
  0xbb   :  { %v189_v35 = vpack.c.bf16 %v139_v33, %v139_v33 }
  0xbd   :  { %299 = vmatmul.msk.bf16.vlgmr.msrb.gmra.mxu3 %vm145_vm0, %v142_v34  ;;  %v215_v36 = vsel %vm194_vm1, %v189_v35, 0 }
  0xbe   :  { %224 = vmatpush.bf16.msrb.mxu0 %v215_v36 }
 0x130   :  { %v161_v37 = vpop.f32.mrf.mxu3 }
 0x131   :  { %v184_v38 = vmul.f32 0.125, %v161_v37 }
 0x133   :  { %v186_v39 = vpack.c.bf16 %v184_v38, %v184_v38 }
 0x135   :  { %300 = vmatmul.msk.bf16.vlgmr.msra.gmra.mxu3 %vm190_vm2, %v186_v39 }
 0x138   :  { %v163_v40 = vpop.f32.mrf.mxu3 }
 0x140   :  { %v180_v41 = vpop.f32.mrf.mxu3 }
 0x141   :  { %v185_v42 = vmul.f32 0.125, %v180_v41 }
 0x143   :  { %v187_v43 = vpack.c.bf16 %v185_v42, %v185_v42 }
 0x145   :  { %301 = vmatmul.msk.bf16.vlgmr.msrb.gmra.mxu0 %vm190_vm2, %v187_v43 }
 0x148   :  { %v182_v44 = vpop.f32.mrf.mxu3 }
 0x1b8   :  { %v207_v45 = vpop.f32.mrf.mxu3 }
 0x1b9   :  { %v230_v46 = vsel %vm145_vm0, %v207_v45, -inf }
 0x1ba   :  { %231 = vmax.xlane.f32.xlu0 %v230_v46 }
 0x1c0   :  { %v209_v47 = vpop.f32.mrf.mxu3 }
 0x1c2   :  { %v226_v48 = vpop.f32.mrf.mxu0 }
 0x1c3   :  { %v233_v49 = vsel %vm145_vm0, %v226_v48, -inf }
 0x1c4   :  { %234 = vmax.xlane.f32.xlu0 %v233_v49 }
 0x1ca   :  { %v228_v50 = vpop.f32.mrf.mxu0 }
 0x22d   :  { %v232_v51 = vpop.xlane.xlu0 %231 }
 0x22e   :  { %v236_v52 = vsub.f32 %v207_v45, %v232_v51 }
 0x230   :  { %v238_v53 = vmul.f32 1.442695, %v236_v52 }
 0x232   :  { %305 = vpow2.f32 %v238_v53 }
 0x237   :  { %v235_v54 = vpop.xlane.xlu0 %234 }
 0x238   :  { %v306_v55 = vpop.eup %305  ;;  %v237_v56 = vsub.f32 %v226_v48, %v235_v54 }
 0x239   :  { %v242_v57 = vsel %vm145_vm0, %v306_v55, 0.0 }
 0x23a   :  { %v240_v58 = vmul.f32 1.442695, %v237_v56  ;;  %243 = vadd.xlane.f32.xlu1 %v242_v57 }
 0x23c   :  { %307 = vpow2.f32 %v240_v58 }
 0x242   :  { %v308_v59 = vpop.eup %307 }
 0x243   :  { %v245_v60 = vsel %vm145_vm0, %v308_v59, 0.0 }
 0x244   :  { %246 = vadd.xlane.f32.xlu1 %v245_v60 }
 0x2ad   :  { %v244_v61 = vpop.xlane.xlu1 %243 }
 0x2ae   :  { %309 = vrcp.f32 %v244_v61  ;;  %v259_v2 = vand.u32 2147483648, %v244_v61  ;;  %v257_v4 = vand.u32 2147483647, %v244_v61  ;;  %vm253_vm4 = vweird.f32 %v244_v61 }
 0x2b0   :  { %v260_v6 = vor.u32 1.1754944e-38, %v259_v2  ;;  %vm258_vm6 = vcmp.eq.f32.partialorder %v257_v4, 8.507059e+37 }
 0x2b4   :  { %v310_v62 = vpop.eup %309 }
 0x2b5   :  { %v249_v63 = vmul.f32 %v310_v62, %v244_v61  ;;  %vm254_vm3 = vweird.f32 %v310_v62 }
 0x2b6   :  { %vm255_vm5 = vmor %vm253_vm4, %vm254_vm3 }
 0x2b7   :  { %v250_v0 = vsub.f32 1.0, %v249_v63  ;;  %v247_v1 = vpop.xlane.xlu1 %246 }
 0x2b8   :  { %311 = vrcp.f32 %v247_v1  ;;  %v273_v13 = vand.u32 2147483648, %v247_v1  ;;  %v271_v15 = vand.u32 2147483647, %v247_v1  ;;  %vm267_vm8 = vweird.f32 %v247_v1 }
 0x2b9   :  { %v251_v3 = vmul.f32 %v310_v62, %v250_v0 }
 0x2ba   :  { %v274_v17 = vor.u32 1.1754944e-38, %v273_v13  ;;  %vm272_vm10 = vcmp.eq.f32.partialorder %v271_v15, 8.507059e+37 }
 0x2bb   :  { %v252_v5 = vadd.f32 %v310_v62, %v251_v3 }
 0x2bd   :  { %v256_v7 = vsel %vm255_vm5, %v310_v62, %v252_v5 }
 0x2be   :  { %v312_v8 = vpop.eup %311  ;;  %v261_v9 = vsel %vm258_vm6, %v260_v6, %v256_v7 }
 0x2bf   :  { %v276_v10 = vmul.f32 %v306_v55, %v261_v9  ;;  %v263_v11 = vmul.f32 %v312_v8, %v247_v1  ;;  %vm268_vm7 = vweird.f32 %v312_v8 }
 0x2c0   :  { %vm269_vm9 = vmor %vm267_vm8, %vm268_vm7 }
 0x2c1   :  { %278 = vst.msk [vmem:[#allocation2] sm:$0xff] %vm145_vm0, %v276_v10  ;;  %v264_v12 = vsub.f32 1.0, %v263_v11 }
 0x2c3   :  { %v265_v14 = vmul.f32 %v312_v8, %v264_v12 }
 0x2c5   :  { %v266_v16 = vadd.f32 %v312_v8, %v265_v14 }
 0x2c7   :  { %v270_v18 = vsel %vm269_vm9, %v312_v8, %v266_v16 }
 0x2c8   :  { %v275_v19 = vsel %vm272_vm10, %v274_v17, %v270_v18 }
 0x2c9   :  { %v277_v20 = vmul.f32 %v308_v59, %v275_v19 }
 0x2cb   :  { %279 = vst.msk [vmem:[#allocation2 + $0x8] sm:$0xff] %vm145_vm0, %v277_v20 }
 0x2cc   :  { %292 = dma.vmem_to_hbm [thread:$0]  %s285_s2, 256, %s287_s7, [#allocation3], %s340_s8, %s340_s8, %s341_s9  }
 0x2cd   :  { %337 = dma.done.wait [#allocation3], 256  }
 0x2ce   :  { %338 = vsyncadd [#allocation3], 4294967040 }
 0x2cf   :  { %297 = vsyncpa [#allocation3], 1 }

</bundles_post_ra>
